<compile_context>
chip_gen: v7x
topology: tpu7x:2x2x1
jax: 0.10.0
libtpu: 0.0.40
codegen_flags: <defaults>
</compile_context>

<pallas_src>
import jax
import jax.numpy as jnp
from jax import lax
from jax.experimental import pallas as pl
from jax.experimental.pallas import tpu as pltpu


def _round_up(x, mult):
    return ((x + mult - 1) // mult) * mult


def _ntk_predict_kernel(k_test_ref, beta_ref, o_ref, acc_ref):
    # k_test_ref: (1, tm, tn)  beta_ref: (1, 1, tn)  o_ref: (1, 1, tm)  acc_ref: (1, tm)
    ni = pl.program_id(2)

    @pl.when(ni == 0)
    def _():
        acc_ref[...] = jnp.zeros_like(acc_ref)

    # beta (1, tn) contracted with k_test (tm, tn) over tn -> (1, tm).
    # Keeps the output lane-dense (last dim = tm, multiple of 128); do NOT flip to a
    # (tm, 1) GEMV output (last dim 1 would force masked vst.msk partial stores).
    acc_ref[...] += lax.dot_general(
        beta_ref[0], k_test_ref[0],
        dimension_numbers=(((1,), (1,)), ((), ())),
        preferred_element_type=jnp.float32,
    )

    @pl.when(ni == pl.num_programs(2) - 1)
    def _():
        o_ref[...] = acc_ref[...][None]


def ntk_predict(k_test, beta, *, tm=256, tn=4096):
    """k_test: (n_class or 1, m, n) f32, beta: (n_class, n) f32 -> (m, n_class) f32."""
    n_class, n = beta.shape
    kc, m, kn = k_test.shape
    assert kn == n, f"k_test last dim {kn} != beta dim {n}"
    shared_test = (kc == 1) and (n_class > 1)   # torch single_kernel: k_test[0] for all classes

    # Tile sizes: multiples of 128 (lane-dense output + (8,128) block constraint),
    # capped so 2 buffers of the k_test tile stay far under v7x's 64 MiB VMEM.
    tm = max(128, min(tm, _round_up(m, 128)))
    tn = max(128, min(tn, _round_up(n, 128)))
    m_pad = _round_up(m, tm)
    n_pad = _round_up(n, tn)

    if (m_pad, n_pad) != (m, n):
        k_test = jnp.pad(k_test, ((0, 0), (0, m_pad - m), (0, n_pad - n)))
    if n_pad != n:
        beta = jnp.pad(beta, ((0, 0), (0, n_pad - n)))
    beta3 = beta.reshape(n_class, 1, n_pad)

    if shared_test:
        kt_map = lambda c, mi, ni: (0, mi, ni)
        kt_bytes = m_pad * n_pad * 4
    else:
        kt_map = lambda c, mi, ni: (c, mi, ni)
        kt_bytes = n_class * m_pad * n_pad * 4

    grid = (n_class, m_pad // tm, n_pad // tn)
    cost = pl.CostEstimate(
        flops=2 * n_class * m_pad * n_pad,
        transcendentals=0,
        bytes_accessed=kt_bytes + 4 * n_class * (n_pad + m_pad),
    )

    pred3 = pl.pallas_call(
        _ntk_predict_kernel,
        out_shape=jax.ShapeDtypeStruct((n_class, 1, m_pad), jnp.float32),
        grid_spec=pltpu.PrefetchScalarGridSpec(
            num_scalar_prefetch=0,
            grid=grid,
            in_specs=[
                pl.BlockSpec((1, tm, tn), kt_map),
                pl.BlockSpec((1, 1, tn), lambda c, mi, ni: (c, 0, ni)),
            ],
            out_specs=pl.BlockSpec((1, 1, tm), lambda c, mi, ni: (c, 0, mi)),
            scratch_shapes=[pltpu.VMEM((1, tm), jnp.float32)],
        ),
        compiler_params=pltpu.CompilerParams(
            dimension_semantics=("parallel", "parallel", "arbitrary"),
            vmem_limit_bytes=48 * 1024 * 1024,
        ),
        cost_estimate=cost,
    )(k_test, beta3)

    # torch.stack(preds, dim=1): (m, n_class).  (Transpose kept for spec parity; callers
    # that accept (n_class, m) can take pred3[:, 0, :m] directly.)
    return pred3[:, 0, :m].T


class FastNTKRegression:
    """JAX/Pallas port of fastNTKRegression (inv=None / multi-kernel / no batching hot path)."""

    def __init__(self, k_train, y, n_class, inv=None, batch_size=None):
        # NOTE: torch uses .double(); TPU has no f64, so float32 is used instead.
        k_train = jnp.asarray(k_train, jnp.float32)
        self.y = jnp.asarray(y)
        self.n_class = n_class
        self.batch_size = batch_size
        self.single_kernel = (k_train.shape[0] == 1)

        n = k_train.shape[1]
        reg = 1e-6  # absolute ridge as in torch; in f32 this can be below round-off
                    # for NTK Grams with a very large diagonal (torch works in f64).
        self.k_train = k_train + reg * jnp.eye(n, dtype=jnp.float32)[None]

        # One-hot indicators over train points: yi[c, j] = 1.0 if y[j] == c else 0.0
        yi = (self.y[None, :] == jnp.arange(n_class)[:, None]).astype(jnp.float32)

        # Solve once at construction (y and k_train never change), so the O(n^3) solve
        # is off the forward hot path.  k_train + reg*I is SPD -> Cholesky (cheaper and
        # numerically better than LU in f32).
        # TODO(synk): the dense linear solve has no clean Pallas equivalent; it is done
        # in plain JAX here (outside the kernel).
        if inv is not None:
            inv = jnp.asarray(inv, jnp.float32)
            if inv.ndim == 2:
                beta = jnp.einsum("ij,cj->ci", inv, yi)
            else:
                beta = jnp.einsum("cij,cj->ci", inv, yi)
        elif self.single_kernel:
            # TODO(synk): torch's single_kernel + batch_size block-diagonal solve is not
            # ported; the shared kernel is solved in full for all class indicators.
            chol = jnp.linalg.cholesky(self.k_train[0])                 # (n, n)
            z = lax.linalg.triangular_solve(chol, yi.T, left_side=True, lower=True)
            beta = lax.linalg.triangular_solve(
                chol, z, left_side=True, lower=True, transpose_a=True).T   # (n_class, n)
        else:
            chol = jnp.linalg.cholesky(self.k_train)                    # (n_class, n, n)
            z = lax.linalg.triangular_solve(chol, yi[..., None], left_side=True, lower=True)
            beta = lax.linalg.triangular_solve(
                chol, z, left_side=True, lower=True, transpose_a=True)[..., 0]
        self.beta = beta.astype(jnp.float32)                            # (n_class, n)

    def __call__(self, k_test):
        k_test = jnp.asarray(k_test, jnp.float32)
        return ntk_predict(k_test, self.beta)


if __name__ == "__main__":
    n_class, n, m, d = 4, 128, 128, 16

    key = jax.random.PRNGKey(0)
    k_feat, k_test_feat, k_lab = jax.random.split(key, 3)

    # Synthetic PSD NTK-style gram matrices (one per class), deterministic.
    feats = jax.random.normal(k_feat, (n_class, n, d), jnp.float32)
    k_train = jnp.einsum("cid,cjd->cij", feats, feats) / d \
        + 0.5 * jnp.eye(n, dtype=jnp.float32)[None]
    test_feats = jax.random.normal(k_test_feat, (n_class, m, d), jnp.float32)
    k_test = jnp.einsum("cid,cjd->cij", test_feats, feats) / d
    y = jax.random.randint(k_lab, (n,), 0, n_class)

    model = FastNTKRegression(k_train, y, n_class)
    y_pred = jax.block_until_ready(model(k_test))
    assert y_pred.shape == (m, n_class)

    # Check 1: Pallas matmul stage vs pure-JAX einsum using the same cached beta.
    ref = jnp.einsum("cmn,cn->mc", k_test.astype(jnp.float32), model.beta)
    assert jnp.allclose(y_pred, ref, atol=1e-4, rtol=1e-4), "Pallas GEMV mismatch"

    # Check 2: cached Cholesky beta vs LU solve (f32 reference of torch semantics).
    yi_ref = (y[None, :] == jnp.arange(n_class)[:, None]).astype(jnp.float32)
    beta_lu = jnp.linalg.solve(model.k_train, yi_ref[..., None])[..., 0]
    assert jnp.allclose(model.beta, beta_lu, atol=2e-3, rtol=2e-3), "beta mismatch"

    # Check 3: ragged shapes (exercises the padding + tiling path).
    m2, n2 = 72, 200
    f2 = jax.random.normal(jax.random.PRNGKey(1), (n_class, n2, d), jnp.float32)
    kt2 = jnp.einsum("cid,cjd->cij", f2, f2) / d + 0.5 * jnp.eye(n2, dtype=jnp.float32)[None]
    tf2 = jax.random.normal(jax.random.PRNGKey(2), (n_class, m2, d), jnp.float32)
    ks2 = jnp.einsum("cid,cjd->cij", tf2, f2) / d
    y2 = jax.random.randint(jax.random.PRNGKey(3), (n2,), 0, n_class)
    model2 = FastNTKRegression(kt2, y2, n_class)
    pred2 = jax.block_until_ready(model2(ks2))
    assert pred2.shape == (m2, n_class)
    ref2 = jnp.einsum("cmn,cn->mc", ks2, model2.beta)
    assert jnp.allclose(pred2, ref2, atol=1e-4, rtol=1e-4), "ragged-shape mismatch"

    print("KERNEL_OK")
</pallas_src>

<mosaic_0001>
module attributes {stable_mosaic.version = 11 : i64} {
  func.func @_ntk_predict_kernel(%arg0: i32, %arg1: i32, %arg2: i32, %arg3: memref<1x128x128xf32, #tpu.memory_space<vmem>>, %arg4: memref<1x1x128xf32, #tpu.memory_space<vmem>>, %arg5: memref<1x1x128xf32, #tpu.memory_space<vmem>>, %arg6: memref<1x128xf32, #tpu.memory_space<vmem>>) attributes {dimension_semantics = [#tpu.dimension_semantics<parallel>, #tpu.dimension_semantics<parallel>, #tpu.dimension_semantics<arbitrary>], iteration_bounds = array<i64: 4, 1, 1>, scalar_prefetch = 0 : i64, scratch_operands = 1 : i64, tpu.core_type = #tpu.core_type<tc>, window_params = [{transform_indices = @transform_0, window_bounds = array<i64: 1, 128, 128>}, {transform_indices = @transform_1, window_bounds = array<i64: 1, 1, 128>}, {transform_indices = @transform_2, window_bounds = array<i64: 1, 1, 128>}]} {
    %c0_i32 = arith.constant 0 : i32
    %0 = arith.cmpi eq, %arg2, %c0_i32 : i32
    %1 = arith.extui %0 : i1 to i32
    %c0_i32_0 = arith.constant 0 : i32
    %2 = arith.cmpi ne, %1, %c0_i32_0 : i32
    scf.if %2 {
      %cst_12 = arith.constant 0.000000e+00 : f32
      %14 = vector.broadcast %cst_12 : f32 to vector<1x128xf32>
      %c0_13 = arith.constant 0 : index
      %c0_14 = arith.constant 0 : index
      %15 = vector.load %arg6[%c0_13, %c0_14] : memref<1x128xf32, #tpu.memory_space<vmem>>, vector<1x128xf32>
      tpu.vector_store %arg6[%c0_13, %c0_14], %14 {strides = array<i32>} : memref<1x128xf32, #tpu.memory_space<vmem>>, vector<1x128xf32>,
    } else {
    }
    %c0 = arith.constant 0 : index
    %c0_1 = arith.constant 0 : index
    %3 = vector.load %arg6[%c0, %c0_1] : memref<1x128xf32, #tpu.memory_space<vmem>>, vector<1x128xf32>
    %c0_2 = arith.constant 0 : index
    %c0_3 = arith.constant 0 : index
    %c0_4 = arith.constant 0 : index
    %4 = vector.load %arg4[%c0_2, %c0_3, %c0_4] : memref<1x1x128xf32, #tpu.memory_space<vmem>>, vector<1x1x128xf32>
    %5 = vector.shape_cast %4 : vector<1x1x128xf32> to vector<1x128xf32>
    %c0_5 = arith.constant 0 : index
    %c0_6 = arith.constant 0 : index
    %c0_7 = arith.constant 0 : index
    %6 = vector.load %arg3[%c0_5, %c0_6, %c0_7] : memref<1x128x128xf32, #tpu.memory_space<vmem>>, vector<1x128x128xf32>
    %7 = vector.shape_cast %6 : vector<1x128x128xf32> to vector<128x128xf32>
    %cst = arith.constant dense<0.000000e+00> : vector<1x128xf32>
    %8 = tpu.matmul %5, %7, %cst {dimension_numbers = #tpu.dot_dimension_numbers<[1], [1], [0], [0], [0, 0, 1, 0], [], []>} : vector<1x128xf32>, vector<128x128xf32>, vector<1x128xf32> -> vector<1x128xf32>
    %9 = arith.addf %3, %8 : vector<1x128xf32>
    %c0_8 = arith.constant 0 : index
    %c0_9 = arith.constant 0 : index
    %10 = vector.load %arg6[%c0_8, %c0_9] : memref<1x128xf32, #tpu.memory_space<vmem>>, vector<1x128xf32>
    tpu.vector_store %arg6[%c0_8, %c0_9], %9 {strides = array<i32>} : memref<1x128xf32, #tpu.memory_space<vmem>>, vector<1x128xf32>,
    %c0_i32_10 = arith.constant 0 : i32
    %11 = arith.cmpi eq, %arg2, %c0_i32_10 : i32
    %12 = arith.extui %11 : i1 to i32
    %c0_i32_11 = arith.constant 0 : i32
    %13 = arith.cmpi ne, %12, %c0_i32_11 : i32
    scf.if %13 {
      %c0_12 = arith.constant 0 : index
      %c0_13 = arith.constant 0 : index
      %14 = vector.load %arg6[%c0_12, %c0_13] : memref<1x128xf32, #tpu.memory_space<vmem>>, vector<1x128xf32>
      %15 = vector.shape_cast %14 : vector<1x128xf32> to vector<1x1x128xf32>
      %c0_14 = arith.constant 0 : index
      %c0_15 = arith.constant 0 : index
      %c0_16 = arith.constant 0 : index
      %16 = vector.load %arg5[%c0_14, %c0_15, %c0_16] : memref<1x1x128xf32, #tpu.memory_space<vmem>>, vector<1x1x128xf32>
      tpu.vector_store %arg5[%c0_14, %c0_15, %c0_16], %15 {strides = array<i32>} : memref<1x1x128xf32, #tpu.memory_space<vmem>>, vector<1x1x128xf32>,
    } else {
    }
    return
  }
  func.func @transform_0(%arg0: i32, %arg1: i32, %arg2: i32) -> (i32, i32, i32) {
    %c0_i32 = arith.constant 0 : i32
    return %arg0, %arg1, %arg2 : i32, i32, i32
  }
  func.func @transform_1(%arg0: i32, %arg1: i32, %arg2: i32) -> (i32, i32, i32) {
    %c0_i32 = arith.constant 0 : i32
    %c0_i32_0 = arith.constant 0 : i32
    return %arg0, %c0_i32, %arg2 : i32, i32, i32
  }
  func.func @transform_2(%arg0: i32, %arg1: i32, %arg2: i32) -> (i32, i32, i32) {
    %c0_i32 = arith.constant 0 : i32
    %c0_i32_0 = arith.constant 0 : i32
    return %arg0, %c0_i32, %arg1 : i32, i32, i32
  }
}

</mosaic_0001>

<bundles_post_ra>
// kernel: tpu_custom_call.1
= control target key start
LH: loop header
LB: loop body
LE: loop exit
PB: predicated region body
PF: predicated region fallthrough
CT: control target
= control target key end

     0   :  { %7 = vsyncpa [#allocation4], 0  ;;  %s1011_s0 = inlined_call_operand.hbm [shape: f32[4,128,128], index: 0, kind: input, shape index: {}]   ;;  %s1012_s1 = inlined_call_operand.hbm [shape: f32[4,1,128], index: 1, kind: input, shape index: {}]   ;;  %s1013_s2 = inlined_call_operand.hbm [shape: f32[4,1,128], index: 2, kind: output, shape index: {}]  }
   0x1   :  { %9 = vsyncpa [#allocation4 + $0x1], 0 }
   0x2   :  { %10 = vsyncpa [#allocation7], 0 }
   0x3   :  { %12 = vsyncpa [#allocation7 + $0x1], 0 }
   0x4   :  { %13 = vsyncpa [#allocation5], 0 }
   0x5   :  { %15 = vsyncpa [#allocation5 + $0x1], 0  ;;  %s777_s9 = smov 0   ;;  %s779_s10 = smov 0  }
   0x6   :  { %s781_s11 = smov 0   ;;  %s783_s12 = smov 0  }
   0x7   :  { %s785_s13 = smov 0   ;;  %s787_s14 = smov 0  }
   0x8 LB: > { %s444_s15 = sadd.s32 4294967295, %s752_s14   ;;  %s445_s16 = sadd.s32 4294967294, %s752_s14   ;;  %s752_s14 = sphi %s787_s14, %s21_s14   ;;  %s748_s13 = sphi %s785_s13, %s1031_s13   ;;  %s744_s12 = sphi %s783_s12, %s1030_s12   ;;  %s740_s11 = sphi %s781_s11, %s1029_s11   ;;  %s736_s10 = sphi %s779_s10, %s1028_s10   ;;  %s732_s9 = sphi %s777_s9, %s1027_s9  }
   0x9   : > { %s40_s17 = sadd.s32 1, %s748_s13  ;;  %s51_s18 = sadd.s32 1, %s740_s11 }
   0xa   : > { %p42_p0 = scmp.ge.s32.totalorder %s40_s17, 4  ;;  %p58_p1 = scmp.ne.s32.totalorder %s740_s11, %s736_s10 }
   0xb   : > { %p59_p2 = scmp.eq.s32.totalorder %s752_s14, 0  ;;  %p64_p3 = scmp.ne.s32.totalorder %s736_s10, %s732_s9 }
   0xc   : > { %s1033_s17 = smov (%p42_p0, %s40_s17), 0  ;;  %p65_p5 = scmp.eq.s32.totalorder %s444_s15, 0 }
   0xd   : > { %p818_p4 = por %p59_p2, %p58_p1  ;;  %s44_s20 = ssub.s32 %s748_s13, %s1033_s17 }
   0xe   : > { %p118_p6 = scmp.eq.s32.totalorder %s444_s15, 3  ;;  %p49_p7 = scmp.eq.s32.totalorder %s44_s20, 0 }
   0xf   : > { %p824_p8 = por %p65_p5, %p64_p3  ;;  %p124_p10 = scmp.eq.s32.totalorder %s445_s16, 3 }
  0x10   : > { %p828_p9 = por %p118_p6, %p58_p1  ;;  %p551_p12 = scmp.lt.s32.totalorder %s752_s14, 4 }
  0x11   : > { %s1017_s21 = scalar_select %p824_p8, 1, 0 }
  0x12   : > { %s1018_s22 = scalar_select %p828_p9, 1, 0 }
  0x13   : > { %s833_s23 = scalar_select %p49_p7, %s740_s11, %s51_s18  }
  0x14   : > { %p835_p11 = por %p124_p10, %p64_p3  ;;  %s841_s25 = sand.u32 1, %s740_s11  }
  0x15   : > { %s448_s26 = sshll.u32 %s841_s25, 7  ;;  %s457_s27 = sshll.u32 %s748_s13, 11 }
  0x16   : > { %s1019_s24 = scalar_select %p835_p11, 1, 0 }
  0x17   : > { %s848_s30 = scalar_lea.hbm %s1011_s0, %s457_s27  ;;  %s148_s3 = scalar_lea.vmem [#allocation3], %s448_s26 }
  0x18   : > { %s158_s4 = sshll.u32 %s148_s3, 4  ;;  %p854_p13 = pnand %p551_p12, %p818_p4  ;;  %s850_s4 = int_to_ptr.vmem [resolvable:$true] %s158_s4 }
  0x19   : > { %s145_s6 = scalar_lea.sflag [#allocation4], %s841_s25  ;;  %s606_s7 = scalar_lea.hbm %s848_s30, 2048 }
  0x1a   : > { %p607_p1 = scmp.ne.s32.totalorder %s848_s30, %s606_s7  ;;  %p608_p2 = pneg %p854_p13 }
  0x1b   : > { %s611_s16 = scalar_lea.hbm %s1011_s0, 8192  ;;  %p612_p4 = scmp.lt.u32.totalorder %s848_s30, %s1011_s0 }
  0x1c   : > { %p609_p3 = pnand %p608_p2, %p607_p1  ;;  %p613_p6 = scmp.lt.u32.totalorder %s611_s16, %s606_s7 }
  0x1d   : > { %p615_p10 = scmp.lt.u32.totalorder %s606_s7, %s848_s30 }
  0x1e   : > { %p610_p5 = pneg %p609_p3  ;;  %p614_p7 = por %p613_p6, %p612_p4 }
  0x20   : > { %p616_p12 = por %p615_p10, %p614_p7 }
  0x22   : > { %p617_p0 = pnand %p616_p12, %p610_p5 }
  0x24   : > { %620 = shalt.err (!%p617_p0)
}
  0x25   : > { %s621_s20 = scalar_lea.vmem %s850_s4, 2048  ;;  %s754_s26 = smov [#allocation3]  }
  0x26   : > { %p622_p1 = scmp.ne.s32.totalorder %s850_s4, %s621_s20  ;;  %s626_s27 = sshll.u32 %s754_s26, 4  ;;  %s627_s27 = int_to_ptr.vmem [resolvable:$false] %s626_s27 }
  0x27   : > { %s628_s28 = scalar_lea.vmem %s627_s27, 4096  ;;  %p629_p9 = scmp.lt.s32.totalorder %s850_s4, %s627_s27 }
  0x28   : > { %p624_p3 = pnand %p622_p1, %p608_p2  ;;  %p630_p4 = scmp.lt.s32.totalorder %s628_s28, %s621_s20 }
  0x2a   : > { %p625_p11 = pneg %p624_p3  ;;  %p631_p6 = por %p630_p4, %p629_p9 }
  0x2c   : > { %p632_p7 = pnand %p631_p6, %p625_p11 }
  0x2e   : > { %635 = shalt.err (!%p632_p7)
}
  0x2f   : > { %s755_s29 = smov 128   ;;  %s756_s3 = smov 8  }
  0x30   : > { %543 = dma.hbm_to_vmem [thread:$0]  (!%p854_p13), %s848_s30, 2048, %s850_s4, %s145_s6, %s755_s29, %s755_s29, %s756_s3  }
  0x31   : > { %p184_p0 = scmp.lt.s32.totalorder %s752_s14, 5  ;;  %s451_s7 = sshll.u32 %s748_s13, 4 }
  0x32   : > { %p1021_p9 = scmp.ge.s32.totalorder %s752_s14, 1  ;;  %s898_s18 = scalar_lea.hbm %s1012_s1, %s451_s7 }
  0x33   : > { %s171_s19 = scalar_lea.vmem [#allocation6], %s841_s25  ;;  %s169_s30 = scalar_lea.sflag [#allocation7], %s841_s25 }
  0x34   : > { %p891_p11 = pnand %p1021_p9, %p184_p0  ;;  %s179_s20 = sshll.u32 %s171_s19, 4  ;;  %s180_s20 = int_to_ptr.vmem [resolvable:$true] %s179_s20 }
  0x35   : > { %s636_s4 = scalar_lea.hbm %s898_s18, 16  ;;  %s641_s27 = scalar_lea.hbm %s1012_s1, 64 }
  0x36   : > { %s1022_s8 = scalar_select %p891_p11, 1, 0 }
  0x37   : > { %p637_p5 = scmp.ne.s32.totalorder %s898_s18, %s636_s4  ;;  %p642_p1 = scmp.lt.u32.totalorder %s898_s18, %s1012_s1 }
  0x38   : > { %p643_p3 = scmp.lt.u32.totalorder %s641_s27, %s636_s4  ;;  %p645_p6 = scmp.lt.u32.totalorder %s636_s4, %s898_s18 }
  0x39   : > { %p639_p10 = pnand %p637_p5, %p608_p2 }
  0x3a   : > { %p644_p4 = por %p643_p3, %p642_p1 }
  0x3b   : > { %p640_p12 = pneg %p639_p10 }
  0x3c   : > { %p646_p7 = por %p645_p6, %p644_p4 }
  0x3e   : > { %p647_p0 = pnand %p646_p7, %p640_p12 }
  0x40   : > { %650 = shalt.err (!%p647_p0)
}
  0x41   : > { %s651_s25 = scalar_lea.vmem %s180_s20, 16  ;;  %s757_s3 = smov [#allocation6]  }
  0x42   : > { %p652_p9 = scmp.ne.s32.totalorder %s180_s20, %s651_s25  ;;  %s656_s7 = sshll.u32 %s757_s3, 4  ;;  %s657_s7 = int_to_ptr.vmem [resolvable:$false] %s656_s7 }
  0x43   : > { %s658_s15 = scalar_lea.vmem %s657_s7, 32  ;;  %p659_p8 = scmp.lt.s32.totalorder %s180_s20, %s657_s7 }
  0x44   : > { %p654_p5 = pnand %p652_p9, %p608_p2  ;;  %p660_p11 = scmp.lt.s32.totalorder %s658_s15, %s651_s25 }
  0x46   : > { %p655_p10 = pneg %p654_p5  ;;  %p661_p1 = por %p660_p11, %p659_p8 }
  0x48   : > { %p662_p3 = pnand %p661_p1, %p655_p10 }
  0x4a   : > { %665 = shalt.err (!%p662_p3)
}
  0x4b   : > { %546 = dma.hbm_to_vmem [thread:$0]  (!%p854_p13), %s898_s18, 16, %s180_s20, %s169_s30  }
  0x4c   : > { %p1023_p12 = scmp.ne.s32.totalorder %s1022_s8, 0 }
  0x4d   : > { %s924_s16 = sand.u32 (!%p1023_p12), 1, %s736_s10   ;;  %p1024_p8 = scmp.ne.s32.totalorder (!%p1023_p12), %s1017_s21, 0 }
  0x4e   : > { %188 = sbr.rel (%p1023_p12) target bundleno = 390 (0x186), region = 28  ;;  %s453_s19 = sshll.u32 (!%p1023_p12), %s924_s16, 7 }
  0x4f   : > { %s191_s4 = scalar_lea.sflag (!%p1023_p12), [#allocation4], %s924_s16  ;;  %s928_s6 = scalar_lea.vmem (!%p1023_p12), [#allocation3], %s453_s19 }
  0x55   : > { %719 = dma.done.wait (%p1024_p8), %s191_s4, 2048  }
  0x56   : > { %721 = vsyncadd (%p1024_p8), %s191_s4, 4294965248  ;;  %s200_s5 = scalar_lea.sflag [#allocation7], %s924_s16  ;;  %s202_s8 = scalar_lea.vmem [#allocation6], %s924_s16 }
  0x57   : > { %723 = dma.done.wait (%p1024_p8), %s200_s5, 16  }
  0x58   : > { %725 = vsyncadd (%p1024_p8), %s200_s5, 4294967280  ;;  %v758_v0 = vmov 0.0|0.0   ;;  %v759_v1 = vmov 0.0   ;;  %vm760_vm0 = vmmov 0   ;;  %v234_v2 = vld [vmem:[%s928_s6] sm:$0xff]  ;;  %v235_v3 = vld [vmem:[%s928_s6 + $0x8] sm:$0xff] }
  0x59   : > { %510 = vmatprep.subr.bf16.mxu0 %v758_v0  ;;  %231 = vst [vmem:[#allocation2] sm:$0x1] %v759_v1  ;;  %507 = vmatprep.mubr.msk.f32.mxu0 %vm760_vm0, %v759_v1  ;;  %v511_v4 = vpack.c.bf16 %v235_v3, %v234_v2  ;;  %v236_v5 = vld [vmem:[%s928_s6 + $0x10] sm:$0xff]  ;;  %v237_v6 = vld [vmem:[%s928_s6 + $0x18] sm:$0xff]  ;;  %v238_v8 = vld [vmem:[%s928_s6 + $0x20] sm:$0xff]  ;;  %s454_s21 = sshll.u32 %s744_s12, 4 }
  0x5a   : > { %v514_v7 = vpack.c.bf16 %v237_v6, %v236_v5  ;;  %v239_v9 = vld [vmem:[%s928_s6 + $0x28] sm:$0xff]  ;;  %v240_v11 = vld [vmem:[%s928_s6 + $0x30] sm:$0xff]  ;;  %v241_v12 = vld [vmem:[%s928_s6 + $0x38] sm:$0xff]  ;;  %s225_s18 = scalar_lea.vmem [#allocation8], %s924_s16  ;;  %s963_s27 = scalar_lea.hbm %s1013_s2, %s454_s21 }
  0x5b   : > { %512 = vmatpush3.bf16.xpose.msra.mxu0 %v511_v4  ;;  %v517_v10 = vpack.c.bf16 %v239_v9, %v238_v8  ;;  %v520_v13 = vpack.c.bf16 %v241_v12, %v240_v11  ;;  %v242_v14 = vld [vmem:[%s928_s6 + $0x40] sm:$0xff]  ;;  %v243_v15 = vld [vmem:[%s928_s6 + $0x48] sm:$0xff]  ;;  %v244_v17 = vld [vmem:[%s928_s6 + $0x50] sm:$0xff]  ;;  %s341_s20 = sshll.u32 %s225_s18, 4  ;;  %s328_s28 = scalar_lea.sflag [#allocation5], %s924_s16  ;;  %s965_s20 = int_to_ptr.vmem [resolvable:$true] %s341_s20 }
  0x5c   : > { %513 = vmatprep.subr.bf16.mxu0 %v758_v0  ;;  %v523_v16 = vpack.c.bf16 %v243_v15, %v242_v14  ;;  %v245_v18 = vld [vmem:[%s928_s6 + $0x58] sm:$0xff]  ;;  %v246_v20 = vld [vmem:[%s928_s6 + $0x60] sm:$0xff]  ;;  %v247_v21 = vld [vmem:[%s928_s6 + $0x68] sm:$0xff]  ;;  %s666_s29 = scalar_lea.vmem %s965_s20, 16  ;;  %p1025_p2 = scmp.ne.s32.totalorder %s1018_s22, 0 }
  0x5d   : > { %v526_v19 = vpack.c.bf16 %v245_v18, %v244_v17  ;;  %v529_v22 = vpack.c.bf16 %v247_v21, %v246_v20  ;;  %v248_v23 = vld [vmem:[%s928_s6 + $0x70] sm:$0xff]  ;;  %v249_v24 = vld [vmem:[%s928_s6 + $0x78] sm:$0xff]  ;;  %p667_p13 = scmp.ne.s32.totalorder %s965_s20, %s666_s29  ;;  %s761_s12 = smov [#allocation8]  }
  0x5e   : > { %v532_v25 = vpack.c.bf16 %v249_v24, %v248_v23  ;;  %v233_v26 = vld [vmem:[%s202_s8] sm:$0x1]  ;;  %s670_s25 = sshll.u32 %s761_s12, 4  ;;  %s671_s25 = int_to_ptr.vmem [resolvable:$false] %s670_s25 }
  0x5f   : > { %p668_p11 = pnand %p667_p13, %p1025_p2  ;;  %s672_s3 = scalar_lea.vmem %s671_s25, 32 }
  0x60   : > { %v232_v27 = vld [vmem:[#allocation2] sm:$0x1]  ;;  %p673_p6 = scmp.lt.s32.totalorder %s965_s20, %s671_s25  ;;  %p674_p7 = scmp.lt.s32.totalorder %s672_s3, %s666_s29 }
  0x61   : > { %p669_p4 = pneg %p668_p11 }
  0x62   : > { %p675_p0 = por %p674_p7, %p673_p6 }
  0x63   : > { %515 = vmatpush3.bf16.xpose.msra.mxu0 %v514_v7 }
  0x64   : > { %516 = vmatprep.subr.bf16.mxu0 %v758_v0  ;;  %p676_p9 = pnand %p675_p0, %p669_p4 }
  0x6b   : > { %518 = vmatpush3.bf16.xpose.msra.mxu0 %v517_v10 }
  0x6c   : > { %519 = vmatprep.subr.bf16.mxu0 %v758_v0 }
  0x73   : > { %521 = vmatpush3.bf16.xpose.msra.mxu0 %v520_v13 }
  0x74   : > { %522 = vmatprep.subr.bf16.mxu0 %v758_v0 }
  0x7b   : > { %524 = vmatpush3.bf16.xpose.msra.mxu0 %v523_v16 }
  0x7c   : > { %525 = vmatprep.subr.bf16.mxu0 %v758_v0 }
  0x83   : > { %527 = vmatpush3.bf16.xpose.msra.mxu0 %v526_v19 }
  0x84   : > { %528 = vmatprep.subr.bf16.mxu0 %v758_v0 }
  0x8b   : > { %530 = vmatpush3.bf16.xpose.msra.mxu0 %v529_v22 }
  0x8c   : > { %531 = vmatprep.subr.bf16.mxu0 %v758_v0 }
  0x93   : > { %533 = vmatpush3.bf16.xpose.msra.mxu0 %v532_v25 }
  0x9a   : > { %508 = vmatmul.mubr.f32.vlgmr.msra.gmra.mrb[0].mxu0 %v233_v26 }
 0x16d   : > { %v316_v28 = vpop.f32.mrb[0].mxu0 }
 0x16e   : > { %v320_v29 = vadd.f32 %v316_v28, %v232_v27  ;;  %v509_v30 = vpop.f32.mrb[1].mxu0 }
 0x170   : > { %321 = vst [vmem:[#allocation2] sm:$0x1] %v320_v29 }
 0x177   : > { %v325_v31 = vld [vmem:[#allocation2] sm:$0x1] }
 0x178   : > { %326 = vst [vmem:[%s225_s18] sm:$0x1] %v325_v31 }
 0x179   : > { %679 = shalt.err (!%p676_p9)
}
 0x17a   : > { %s680_s7 = scalar_lea.hbm %s963_s27, 16  ;;  %s684_s19 = scalar_lea.hbm %s1013_s2, 64 }
 0x17b   : > { %p681_p5 = scmp.ne.s32.totalorder %s963_s27, %s680_s7  ;;  %p685_p3 = scmp.lt.u32.totalorder %s963_s27, %s1013_s2 }
 0x17c   : > { %p686_p12 = scmp.lt.u32.totalorder %s684_s19, %s680_s7  ;;  %p688_p13 = scmp.lt.u32.totalorder %s680_s7, %s963_s27 }
 0x17d   : > { %p682_p10 = pnand %p681_p5, %p1025_p2 }
 0x17e   : > { %p687_p8 = por %p686_p12, %p685_p3 }
 0x17f   : > { %p683_p1 = pneg %p682_p10 }
 0x180   : > { %p689_p11 = por %p688_p13, %p687_p8 }
 0x182   : > { %p690_p4 = pnand %p689_p11, %p683_p1 }
 0x184   : > { %693 = shalt.err (!%p690_p4)
}
 0x185   : > { %538 = dma.vmem_to_hbm [thread:$0]  (%p1025_p2), %s965_s20, 16, %s963_s27, %s328_s28  }
 0x186 PF: > { %p552_p6 = scmp.ge.s32.totalorder %s752_s14, 2  ;;  %s353_s5 = sand.u32 1, %s732_s9  }
 0x187   : > { %p1026_p7 = scmp.ne.s32.totalorder %s1019_s24, 0  ;;  %s354_s8 = scalar_lea.sflag [#allocation5], %s353_s5 }
 0x189   : > { %p548_p0 = pnand %p552_p6, %p1026_p7 }
 0x18b   : > { %727 = dma.done.wait (!%p548_p0), %s354_s8, 16  }
 0x18c   : > { %729 = vsyncadd (!%p548_p0), %s354_s8, 4294967280  ;;  %s21_s14 = sadd.s32 1, %s752_s14   ;;  %s1027_s9 = smov %s736_s10 }
 0x18d   : > { %p18_p9 = scmp.ge.s32.totalorder %s21_s14, 6   ;;  %s1028_s10 = smov %s740_s11 }
 0x18e   : > { %s1029_s11 = smov %s833_s23  ;;  %s1030_s12 = smov %s748_s13 }
 0x18f   : > { %s1031_s13 = smov %s1033_s17  ;;  %20 = sbr.rel (!%p18_p9) target bundleno = 8 (0x8), region = 94 }
 0x196   :  { %358 = vsyncpa [#allocation4], 1 }
 0x197   :  { %360 = vsyncpa [#allocation4 + $0x1], 1 }
 0x198   :  { %361 = vsyncpa [#allocation7], 1 }
 0x199   :  { %363 = vsyncpa [#allocation7 + $0x1], 1 }
 0x19a   :  { %364 = vsyncpa [#allocation5], 1 }
 0x19b   :  { %366 = vsyncpa [#allocation5 + $0x1], 1 }

</bundles_post_ra>
